<compile_context>
chip_gen: v5e
topology: v5e:2x2
jax: 0.10.0
libtpu: 0.0.40
codegen_flags: <defaults>
</compile_context>

<pallas_src>
import jax
import jax.numpy as jnp
from jax.experimental import pallas as pl
from jax.experimental.pallas import tpu as pltpu

IN_FEATURES = 2048
NUM_CLASSES = 2


def classifier_kernel(x_ref, v_ref, gb_ref, o_ref):
    x = x_ref[...]                      # [B, IN]   bf16
    v = v_ref[...]                      # [OUT, IN] bf16

    # --- weight-norm scale, f32 path ---------------------------------------------
    # Per-row norm produced directly in a lane-major [1, OUT] layout by contracting a
    # ones-row against v*v on the MXU (no sublane<->lane relayout needed for the
    # epilogue broadcast).
    v_f32 = v.astype(jnp.float32)
    ones_row = jnp.ones((1, v_f32.shape[1]), jnp.float32)
    norm_sq = jax.lax.dot_general(
        ones_row, v_f32 * v_f32,
        dimension_numbers=(((1,), (1,)), ((), ())),
        preferred_element_type=jnp.float32)                    # [1, OUT]
    # Intentional divergence: PyTorch weight_norm would emit inf/NaN for an all-zero
    # row; the clamp only matters for pathological weights.
    inv_norm = jax.lax.rsqrt(jnp.maximum(norm_sq, 1e-12))
    g = gb_ref[0:1, :]                                         # [1, OUT] f32 (view)
    b = gb_ref[1:2, :]                                         # [1, OUT] f32 (view)
    s = g * inv_norm                                           # [1, OUT]

    # --- y = x @ v.T, native bf16 MXU operands, f32 accumulate ---------------------
    y = jax.lax.dot_general(
        x, v,
        dimension_numbers=(((1,), (1,)), ((), ())),
        preferred_element_type=jnp.float32)                    # [B, OUT] f32

    # Epilogue: fold the weight-norm scale and bias into the output.
    o_ref[...] = y * s + b


def classifier_forward(x, v, g, b):
    """x: [B, IN]; v: [OUT, IN]; g: [OUT]; b: [OUT] -> [B, OUT] f32."""
    B, IN = x.shape
    OUT = v.shape[0]

    # bf16 matmul operands (half the DMA, native MXU path); scale/bias stay f32.
    x_bf16 = x.astype(jnp.bfloat16)
    v_bf16 = v.astype(jnp.bfloat16)
    gb = jnp.stack([g.astype(jnp.float32), b.astype(jnp.float32)], axis=0)  # [2, OUT]

    cost = pl.CostEstimate(
        flops=2 * B * IN * OUT + 2 * OUT * IN,
        transcendentals=OUT,
        bytes_accessed=2 * (B * IN + OUT * IN) + 4 * (2 * OUT + B * OUT),
    )

    return pl.pallas_call(
        classifier_kernel,
        out_shape=jax.ShapeDtypeStruct((B, OUT), jnp.float32),
        grid=(1,),
        in_specs=[
            pl.BlockSpec((B, IN), lambda i: (0, 0)),      # full-extent blocks are
            pl.BlockSpec((OUT, IN), lambda i: (0, 0)),    # exempt from the (8,128) rule
            pl.BlockSpec((2, OUT), lambda i: (0, 0)),
        ],
        out_specs=pl.BlockSpec((B, OUT), lambda i: (0, 0)),
        compiler_params=pltpu.CompilerParams(
            dimension_semantics=("arbitrary",)),
        cost_estimate=cost,
    )(x_bf16, v_bf16, gb)


def init_params(key, num_classes=NUM_CLASSES, in_features=IN_FEATURES):
    # Deterministic synthetic init mirroring the PyTorch module:
    #   v ~ xavier_normal (std = sqrt(2 / (fan_in + fan_out)))
    #   g = ||v||_row  (weight_norm init => effective weight == v initially)
    #   bias = 0
    std = (2.0 / (in_features + num_classes)) ** 0.5
    v = jax.random.normal(key, (num_classes, in_features), jnp.float32) * std
    g = jnp.sqrt(jnp.sum(v * v, axis=1))
    b = jnp.zeros((num_classes,), jnp.float32)
    return v, g, b


if __name__ == "__main__":
    key = jax.random.PRNGKey(0)
    k_x, k_w = jax.random.split(key)

    B = 2
    x = jax.random.normal(k_x, (B, IN_FEATURES), jnp.float32)
    v, g, b = init_params(k_w)

    out = jax.block_until_ready(classifier_forward(x, v, g, b))
    assert out.shape == (B, NUM_CLASSES)

    # (1) Matched-precision reference (same bf16 operands / f32 norm path) -> tight check.
    xb = x.astype(jnp.bfloat16)
    vb = v.astype(jnp.bfloat16)
    vf = vb.astype(jnp.float32)
    s_ref = g / jnp.sqrt(jnp.sum(vf * vf, axis=1))
    ref_matched = jax.lax.dot_general(
        xb, vb, (((1,), (1,)), ((), ())),
        preferred_element_type=jnp.float32) * s_ref[None, :] + b[None, :]
    assert jnp.allclose(out, ref_matched, atol=1e-3, rtol=1e-3), (out, ref_matched)

    # (2) Full-f32 PyTorch-semantics reference -> loose check (bf16 operand quantization
    #     contributes ~0.3% relative error on a 2048-long contraction).
    w_eff = g[:, None] * v / jnp.linalg.norm(v, axis=1, keepdims=True)
    ref_f32 = x @ w_eff.T + b
    assert jnp.allclose(out, ref_f32, atol=5e-2, rtol=5e-2), (out, ref_f32)

    print("KERNEL_OK")
</pallas_src>

<mosaic_0001>
module attributes {stable_mosaic.version = 11 : i64} {
  func.func @classifier_kernel(%arg0: i32, %arg1: memref<2x2048xbf16, #tpu.memory_space<vmem>>, %arg2: memref<2x2048xbf16, #tpu.memory_space<vmem>>, %arg3: memref<2x2xf32, #tpu.memory_space<vmem>>, %arg4: memref<2x2xf32, #tpu.memory_space<vmem>>) attributes {dimension_semantics = [#tpu.dimension_semantics<arbitrary>], iteration_bounds = array<i64: 1>, scalar_prefetch = 0 : i64, scratch_operands = 0 : i64, tpu.core_type = #tpu.core_type<tc>, window_params = [{pipeline_mode = #tpu.pipeline_mode<synchronous>, transform_indices = @transform_0, window_bounds = array<i64: 2, 2048>}, {pipeline_mode = #tpu.pipeline_mode<synchronous>, transform_indices = @transform_1, window_bounds = array<i64: 2, 2048>}, {pipeline_mode = #tpu.pipeline_mode<synchronous>, transform_indices = @transform_2, window_bounds = array<i64: 2, 2>}, {pipeline_mode = #tpu.pipeline_mode<synchronous>, transform_indices = @transform_3, window_bounds = array<i64: 2, 2>}]} {
    %c0 = arith.constant 0 : index
    %c0_0 = arith.constant 0 : index
    %0 = vector.load %arg1[%c0, %c0_0] : memref<2x2048xbf16, #tpu.memory_space<vmem>>, vector<2x2048xbf16>
    %c0_1 = arith.constant 0 : index
    %c0_2 = arith.constant 0 : index
    %1 = vector.load %arg2[%c0_1, %c0_2] : memref<2x2048xbf16, #tpu.memory_space<vmem>>, vector<2x2048xbf16>
    %2 = arith.extf %1 : vector<2x2048xbf16> to vector<2x2048xf32>
    %cst = arith.constant 1.000000e+00 : f32
    %3 = vector.broadcast %cst : f32 to vector<1x2048xf32>
    %4 = arith.mulf %2, %2 : vector<2x2048xf32>
    %cst_3 = arith.constant dense<0.000000e+00> : vector<1x2xf32>
    %5 = tpu.matmul %3, %4, %cst_3 {dimension_numbers = #tpu.dot_dimension_numbers<[1], [1], [0], [0], [0, 0, 1, 0], [], []>} : vector<1x2048xf32>, vector<2x2048xf32>, vector<1x2xf32> -> vector<1x2xf32>
    %cst_4 = arith.constant 9.99999996E-13 : f32
    %6 = vector.broadcast %cst_4 : f32 to vector<1x2xf32>
    %7 = arith.maximumf %5, %6 : vector<1x2xf32>
    %8 = math.rsqrt %7 : vector<1x2xf32>
    %c0_5 = arith.constant 0 : index
    %c0_6 = arith.constant 0 : index
    %9 = vector.load %arg3[%c0_5, %c0_6] : memref<2x2xf32, #tpu.memory_space<vmem>>, vector<1x2xf32>
    %c1 = arith.constant 1 : index
    %c0_7 = arith.constant 0 : index
    %10 = vector.load %arg3[%c1, %c0_7] : memref<2x2xf32, #tpu.memory_space<vmem>>, vector<1x2xf32>
    %11 = arith.mulf %9, %8 : vector<1x2xf32>
    %cst_8 = arith.constant dense<0.000000e+00> : vector<2x2xf32>
    %12 = tpu.matmul %0, %1, %cst_8 {dimension_numbers = #tpu.dot_dimension_numbers<[1], [1], [0], [0], [0, 0, 1, 0], [], []>} : vector<2x2048xbf16>, vector<2x2048xbf16>, vector<2x2xf32> -> vector<2x2xf32>
    %13 = vector.broadcast %11 : vector<1x2xf32> to vector<2x2xf32>
    %14 = arith.mulf %12, %13 : vector<2x2xf32>
    %15 = vector.broadcast %10 : vector<1x2xf32> to vector<2x2xf32>
    %16 = arith.addf %14, %15 : vector<2x2xf32>
    %c0_9 = arith.constant 0 : index
    %c0_10 = arith.constant 0 : index
    %17 = vector.load %arg4[%c0_9, %c0_10] : memref<2x2xf32, #tpu.memory_space<vmem>>, vector<2x2xf32>
    tpu.vector_store %arg4[%c0_9, %c0_10], %16 {strides = array<i32>} : memref<2x2xf32, #tpu.memory_space<vmem>>, vector<2x2xf32>,
    return
  }
  func.func @transform_0(%arg0: i32) -> (i32, i32) {
    %c0_i32 = arith.constant 0 : i32
    %c0_i32_0 = arith.constant 0 : i32
    %c0_i32_1 = arith.constant 0 : i32
    return %c0_i32, %c0_i32_0 : i32, i32
  }
  func.func @transform_1(%arg0: i32) -> (i32, i32) {
    %c0_i32 = arith.constant 0 : i32
    %c0_i32_0 = arith.constant 0 : i32
    %c0_i32_1 = arith.constant 0 : i32
    return %c0_i32, %c0_i32_0 : i32, i32
  }
  func.func @transform_2(%arg0: i32) -> (i32, i32) {
    %c0_i32 = arith.constant 0 : i32
    %c0_i32_0 = arith.constant 0 : i32
    %c0_i32_1 = arith.constant 0 : i32
    return %c0_i32, %c0_i32_0 : i32, i32
  }
  func.func @transform_3(%arg0: i32) -> (i32, i32) {
    %c0_i32 = arith.constant 0 : i32
    %c0_i32_0 = arith.constant 0 : i32
    %c0_i32_1 = arith.constant 0 : i32
    return %c0_i32, %c0_i32_0 : i32, i32
  }
}

</mosaic_0001>

<bundles_post_ra>
// kernel: tpu_custom_call.1
= control target key start
LH: loop header
LB: loop body
LE: loop exit
PB: predicated region body
PF: predicated region fallthrough
CT: control target
= control target key end

     0   :  { %8 = vsyncpa [#allocation3], 0  ;;  %s905_s0 = inlined_call_operand.hbm [shape: bf16[2,2048], index: 0, kind: input, shape index: {}]   ;;  %s906_s1 = inlined_call_operand.hbm [shape: bf16[2,2048], index: 1, kind: input, shape index: {}]   ;;  %s907_s2 = inlined_call_operand.hbm [shape: f32[2,2], index: 2, kind: input, shape index: {}]   ;;  %s908_s3 = inlined_call_operand.hbm [shape: f32[2,2], index: 3, kind: output, shape index: {}]  }
   0x1   :  { %9 = vsyncpa [#allocation6], 0  ;;  %s27_s14 = sshll.u32 %s906_s1, 4  ;;  %s28_s14 = int_to_ptr.hbm [resolvable:$true] %s27_s14 }
   0x2   :  { %10 = vsyncpa [#allocation4], 0  ;;  %s858_s15 = smov [#allocation5]   ;;  %s16_s19 = sshll.u32 %s905_s0, 4  ;;  %s17_s19 = int_to_ptr.hbm [resolvable:$true] %s16_s19 }
   0x3   :  { %s29_s16 = sshll.u32 %s858_s15, 4  ;;  %s859_s20 = smov [#allocation2]   ;;  %s30_s16 = int_to_ptr.vmem [resolvable:$true] %s29_s16 }
   0x4   :  { %32 = dma.hbm_to_vmem [thread:$0]  %s28_s14, 256, %s30_s16, [#allocation6]  }
   0x5   :  { %s18_s21 = sshll.u32 %s859_s20, 4  ;;  %s38_s24 = sshll.u32 %s907_s2, 4  ;;  %s19_s21 = int_to_ptr.vmem [resolvable:$true] %s18_s21  ;;  %s39_s24 = int_to_ptr.hbm [resolvable:$true] %s38_s24 }
   0x6   :  { %21 = dma.hbm_to_vmem [thread:$0]  %s17_s19, 256, %s19_s21, [#allocation3]  }
   0x7   :  { %s860_s1 = smov [#allocation7]  }
   0x8   :  { %s40_s25 = sshll.u32 %s860_s1, 4  ;;  %s41_s25 = int_to_ptr.vmem [resolvable:$true] %s40_s25 }
   0x9   :  { %43 = dma.hbm_to_vmem [thread:$0]  %s39_s24, 32, %s41_s25, [#allocation6]  }
   0xa   :  { %852 = dma.done.wait [#allocation3], 256  }
   0xb   :  { %853 = vsyncadd [#allocation3], 4294967040 }
   0xc   :  { %854 = dma.done.wait [#allocation6], 288  }
   0xd   :  { %855 = vsyncadd [#allocation6], 4294967008  ;;  %v892_v0 = vld [vmem:[#allocation5] sm:$0xff]  ;;  %v896_v5 = vld [vmem:[#allocation5 + $0x8] sm:$0xff]  ;;  %v861_v18 = vmov 1.0   ;;  %s862_s0 = smov [#allocation8]  }
   0xe   :  { %v61_v1 = vunpack.c.l.bf16 %v892_v0  ;;  %v62_v2 = vunpack.c.h.bf16 %v892_v0  ;;  %v63_v6 = vunpack.c.l.bf16 %v896_v5  ;;  %v64_v7 = vunpack.c.h.bf16 %v896_v5  ;;  %v57_v19 = vld [vmem:[#allocation2] sm:$0xff]  ;;  %v58_v28 = vld [vmem:[#allocation2 + $0x8] sm:$0xff]  ;;  %s735_s2 = sshll.u32 %s862_s0, 4  ;;  %s737_s28 = sshll.u32 %s908_s3, 4  ;;  %s736_s2 = int_to_ptr.vmem [resolvable:$true] %s735_s2  ;;  %s738_s28 = int_to_ptr.hbm [resolvable:$true] %s737_s28 }
   0xf   :  { %vm728_vm3 = vcmask 9216  }
  0x10   :  { %v65_v3 = vmul.f32 %v61_v1, %v61_v1  ;;  %v66_v4 = vmul.f32 %v62_v2, %v62_v2  ;;  %v67_v10 = vmul.f32 %v63_v6, %v63_v6  ;;  %v68_v12 = vmul.f32 %v64_v7, %v64_v7 }
  0x12   :  { %73 = vst [vmem:[#allocation1] ss:$4 sm:$0xff] %v65_v3 }
  0x13   :  { %75 = vst [vmem:[#allocation1 + $0x20] ss:$4 sm:$0xff] %v66_v4 }
  0x19   :  { %v78_v8 = vld.sshfl [vmem:[#allocation1 + $0x10] sm:$0xff pattern:$0x73625140]  ;;  %v76_v9 = vld.sshfl [vmem:[#allocation1] sm:$0xff pattern:$0x73625140] }
  0x1a   :  { %165 = vmatpush.xpose.msra.mxu2 %v78_v8  ;;  %125 = vmatpush.xpose.msra.mxu0 %v76_v9  ;;  %v79_v11 = vld.sshfl [vmem:[#allocation1 + $0x18] sm:$0xff pattern:$0x73625140]  ;;  %v77_v13 = vld.sshfl [vmem:[#allocation1 + $0x8] sm:$0xff pattern:$0x73625140] }
  0x1b   :  { %185 = vmatpush.xpose.msra.mxu3 %v79_v11  ;;  %v80_v14 = vld.sshfl [vmem:[#allocation1 + $0x20] sm:$0xff pattern:$0x73625140]  ;;  %v81_v15 = vld.sshfl [vmem:[#allocation1 + $0x28] sm:$0xff pattern:$0x73625140]  ;;  %145 = vmatpush.xpose.msra.mxu1 %v77_v13 }
  0x1c   :  { %v82_v16 = vld.sshfl [vmem:[#allocation1 + $0x30] sm:$0xff pattern:$0x73625140]  ;;  %v83_v17 = vld.sshfl [vmem:[#allocation1 + $0x38] sm:$0xff pattern:$0x73625140] }
  0x1d   :  { %166 = vmatmul.f32.vlgmr.msra.gmra.mxu2 %v861_v18  ;;  %84 = vst [vmem:[#allocation1] ss:$4 sm:$0xff] %v67_v10  ;;  %126 = vmatmul.f32.vlgmr.msra.gmra.mxu0 %v861_v18 }
  0x1e   :  { %205 = vmatpush.xpose.msrb.mxu0 %v80_v14  ;;  %85 = vst [vmem:[#allocation1 + $0x20] ss:$4 sm:$0xff] %v68_v12  ;;  %186 = vmatmul.f32.vlgmr.msra.gmra.mxu3 %v861_v18 }
  0x1f   :  { %225 = vmatpush.xpose.msrb.mxu1 %v81_v15  ;;  %245 = vmatpush.xpose.msrb.mxu2 %v82_v16 }
  0x20   :  { %146 = vmatmul.f32.vlgmr.msra.gmra.mxu1 %v861_v18  ;;  %265 = vmatpush.xpose.msrb.mxu3 %v83_v17 }
  0x24   :  { %v86_v20 = vld.sshfl [vmem:[#allocation1] sm:$0xff pattern:$0x73625140]  ;;  %v87_v21 = vld.sshfl [vmem:[#allocation1 + $0x8] sm:$0xff pattern:$0x73625140] }
  0x25   :  { %v88_v22 = vld.sshfl [vmem:[#allocation1 + $0x10] sm:$0xff pattern:$0x73625140]  ;;  %v89_v23 = vld.sshfl [vmem:[#allocation1 + $0x18] sm:$0xff pattern:$0x73625140]  ;;  %246 = vmatmul.f32.vlgmr.msrb.gmra.mxu2 %v861_v18  ;;  %206 = vmatmul.f32.vlgmr.msrb.gmra.mxu0 %v861_v18 }
  0x26   :  { %v90_v24 = vld.sshfl [vmem:[#allocation1 + $0x20] sm:$0xff pattern:$0x73625140]  ;;  %v91_v25 = vld.sshfl [vmem:[#allocation1 + $0x28] sm:$0xff pattern:$0x73625140]  ;;  %266 = vmatmul.f32.vlgmr.msrb.gmra.mxu3 %v861_v18  ;;  %325 = vmatpush.xpose.msra.mxu2 %v88_v22 }
  0x27   :  { %v92_v26 = vld.sshfl [vmem:[#allocation1 + $0x30] sm:$0xff pattern:$0x73625140]  ;;  %v93_v27 = vld.sshfl [vmem:[#allocation1 + $0x38] sm:$0xff pattern:$0x73625140]  ;;  %285 = vmatpush.xpose.msra.mxu0 %v86_v20  ;;  %345 = vmatpush.xpose.msra.mxu3 %v89_v23 }
  0x28   :  { %226 = vmatmul.f32.vlgmr.msrb.gmra.mxu1 %v861_v18  ;;  %445 = vst [vmem:[#allocation1] ss:$9 sm:$0xff] %v57_v19 }
  0x29   :  { %305 = vmatpush.xpose.msra.mxu1 %v87_v21 }
  0x2a   :  { %405 = vmatpush.xpose.msrb.mxu2 %v92_v26 }
  0x2b   :  { %365 = vmatpush.xpose.msrb.mxu0 %v90_v24  ;;  %425 = vmatpush.xpose.msrb.mxu3 %v93_v27 }
  0x2d   :  { %385 = vmatpush.xpose.msrb.mxu1 %v91_v25  ;;  %326 = vmatmul.f32.vlgmr.msra.gmra.mxu2 %v861_v18 }
  0x2e   :  { %286 = vmatmul.f32.vlgmr.msra.gmra.mxu0 %v861_v18  ;;  %346 = vmatmul.f32.vlgmr.msra.gmra.mxu3 %v861_v18 }
  0x2f   :  { %v446_v29 = vld [vmem:[#allocation1] sm:$0xff]  ;;  %v447_v30 = vld [vmem:[#allocation1 + $0x9] sm:$0xff]  ;;  %v448_v31 = vld [vmem:[#allocation1 + $0x12] sm:$0xff] }
  0x30   :  { %306 = vmatmul.f32.vlgmr.msra.gmra.mxu1 %v861_v18  ;;  %v449_v32 = vld [vmem:[#allocation1 + $0x1b] sm:$0xff]  ;;  %v450_v33 = vld [vmem:[#allocation1 + $0x24] sm:$0xff]  ;;  %v451_v34 = vld [vmem:[#allocation1 + $0x2d] sm:$0xff] }
  0x31   :  { %v452_v35 = vld [vmem:[#allocation1 + $0x36] sm:$0xff]  ;;  %v453_v36 = vld [vmem:[#allocation1 + $0x3f] sm:$0xff] }
  0x32   :  { %455 = vst [vmem:[#allocation1] ss:$9 sm:$0xff] %v58_v28 }
  0x35   :  { %406 = vmatmul.f32.vlgmr.msrb.gmra.mxu2 %v861_v18 }
  0x36   :  { %366 = vmatmul.f32.vlgmr.msrb.gmra.mxu0 %v861_v18  ;;  %426 = vmatmul.f32.vlgmr.msrb.gmra.mxu3 %v861_v18 }
  0x38   :  { %386 = vmatmul.f32.vlgmr.msrb.gmra.mxu1 %v861_v18 }
  0x39   :  { %v456_v37 = vld [vmem:[#allocation1] sm:$0xff]  ;;  %v457_v38 = vld [vmem:[#allocation1 + $0x9] sm:$0xff]  ;;  %v458_v39 = vld [vmem:[#allocation1 + $0x12] sm:$0xff] }
  0x3a   :  { %v459_v40 = vld [vmem:[#allocation1 + $0x1b] sm:$0xff]  ;;  %v460_v41 = vld [vmem:[#allocation1 + $0x24] sm:$0xff]  ;;  %v461_v42 = vld [vmem:[#allocation1 + $0x2d] sm:$0xff] }
  0x3b   :  { %v462_v43 = vld [vmem:[#allocation1 + $0x36] sm:$0xff]  ;;  %v463_v44 = vld [vmem:[#allocation1 + $0x3f] sm:$0xff] }
  0x3c   :  { %481 = vst [vmem:[#allocation1] ss:$9 sm:$0xff] %v892_v0 }
  0x43   :  { %v482_v45 = vld [vmem:[#allocation1] sm:$0xff]  ;;  %v483_v46 = vld [vmem:[#allocation1 + $0x9] sm:$0xff]  ;;  %v484_v47 = vld [vmem:[#allocation1 + $0x12] sm:$0xff] }
  0x44   :  { %523 = vmatpush.bf16.xpose.msra.mxu0 %v482_v45  ;;  %536 = vmatpush.bf16.xpose.msra.mxu1 %v483_v46  ;;  %v485_v48 = vld [vmem:[#allocation1 + $0x1b] sm:$0xff]  ;;  %v486_v50 = vld [vmem:[#allocation1 + $0x24] sm:$0xff]  ;;  %v487_v52 = vld [vmem:[#allocation1 + $0x2d] sm:$0xff] }
  0x45   :  { %v488_v49 = vld [vmem:[#allocation1 + $0x36] sm:$0xff]  ;;  %549 = vmatpush.bf16.xpose.msra.mxu2 %v484_v47  ;;  %562 = vmatpush.bf16.xpose.msra.mxu3 %v485_v48  ;;  %v489_v51 = vld [vmem:[#allocation1 + $0x3f] sm:$0xff] }
  0x46   :  { %491 = vst [vmem:[#allocation1] ss:$9 sm:$0xff] %v896_v5 }
  0x4b   :  { %524 = vmatmul.bf16.vlgmr.msra.gmra.mxu0 %v446_v29  ;;  %537 = vmatmul.bf16.vlgmr.msra.gmra.mxu1 %v447_v30 }
  0x4c   :  { %575 = vmatpush.bf16.xpose.msrb.mxu0 %v486_v50  ;;  %588 = vmatpush.bf16.xpose.msrb.mxu1 %v487_v52 }
  0x4d   :  { %601 = vmatpush.bf16.xpose.msrb.mxu2 %v488_v49  ;;  %614 = vmatpush.bf16.xpose.msrb.mxu3 %v489_v51  ;;  %v494_v53 = vld [vmem:[#allocation1 + $0x12] sm:$0xff]  ;;  %v492_v54 = vld [vmem:[#allocation1] sm:$0xff]  ;;  %v493_v56 = vld [vmem:[#allocation1 + $0x9] sm:$0xff] }
  0x4e   :  { %550 = vmatmul.bf16.vlgmr.msra.gmra.mxu2 %v448_v31  ;;  %563 = vmatmul.bf16.vlgmr.msra.gmra.mxu3 %v449_v32  ;;  %v495_v55 = vld [vmem:[#allocation1 + $0x1b] sm:$0xff]  ;;  %v496_v58 = vld [vmem:[#allocation1 + $0x24] sm:$0xff]  ;;  %v497_v60 = vld [vmem:[#allocation1 + $0x2d] sm:$0xff] }
  0x4f   :  { %v498_v57 = vld [vmem:[#allocation1 + $0x36] sm:$0xff]  ;;  %v499_v59 = vld [vmem:[#allocation1 + $0x3f] sm:$0xff] }
  0x54   :  { %627 = vmatpush.bf16.xpose.msra.mxu0 %v492_v54  ;;  %640 = vmatpush.bf16.xpose.msra.mxu1 %v493_v56 }
  0x55   :  { %653 = vmatpush.bf16.xpose.msra.mxu2 %v494_v53  ;;  %666 = vmatpush.bf16.xpose.msra.mxu3 %v495_v55 }
  0x5b   :  { %576 = vmatmul.bf16.vlgmr.msrb.gmra.mxu0 %v450_v33  ;;  %589 = vmatmul.bf16.vlgmr.msrb.gmra.mxu1 %v451_v34 }
  0x5c   :  { %679 = vmatpush.bf16.xpose.msrb.mxu0 %v496_v58  ;;  %692 = vmatpush.bf16.xpose.msrb.mxu1 %v497_v60 }
  0x5e   :  { %602 = vmatmul.bf16.vlgmr.msrb.gmra.mxu2 %v452_v35  ;;  %615 = vmatmul.bf16.vlgmr.msrb.gmra.mxu3 %v453_v36 }
  0x5f   :  { %705 = vmatpush.bf16.xpose.msrb.mxu2 %v498_v57  ;;  %718 = vmatpush.bf16.xpose.msrb.mxu3 %v499_v59 }
  0x6b   :  { %628 = vmatmul.bf16.vlgmr.msra.gmra.mxu0 %v456_v37  ;;  %641 = vmatmul.bf16.vlgmr.msra.gmra.mxu1 %v457_v38 }
  0x6e   :  { %654 = vmatmul.bf16.vlgmr.msra.gmra.mxu2 %v458_v39  ;;  %667 = vmatmul.bf16.vlgmr.msra.gmra.mxu3 %v459_v40 }
  0x7b   :  { %680 = vmatmul.bf16.vlgmr.msrb.gmra.mxu0 %v460_v41  ;;  %693 = vmatmul.bf16.vlgmr.msrb.gmra.mxu1 %v461_v42 }
  0x7e   :  { %706 = vmatmul.bf16.vlgmr.msrb.gmra.mxu2 %v462_v43  ;;  %719 = vmatmul.bf16.vlgmr.msrb.gmra.mxu3 %v463_v44 }
  0x9a   :  { %v127_v62 = vpop.f32.mrf.mxu0 }
  0x9d   :  { %v147_v61 = vpop.f32.mrf.mxu1 }
  0x9e   :  { %v148_v63 = vadd.f32 %v147_v61, %v127_v62 }
  0xa0   :  { %v167_v0 = vpop.f32.mrf.mxu2 }
  0xa1   :  { %v168_v1 = vadd.f32 %v167_v0, %v148_v63  ;;  %v187_v2 = vpop.f32.mrf.mxu3 }
  0xa2   :  { %v207_v4 = vpop.f32.mrf.mxu0 }
  0xa3   :  { %v188_v3 = vadd.f32 %v187_v2, %v168_v1 }
  0xa5   :  { %v208_v5 = vadd.f32 %v207_v4, %v188_v3  ;;  %v227_v6 = vpop.f32.mrf.mxu1 }
  0xa7   :  { %v228_v7 = vadd.f32 %v227_v6, %v208_v5 }
  0xa8   :  { %v247_v8 = vpop.f32.mrf.mxu2 }
  0xa9   :  { %v248_v9 = vadd.f32 %v247_v8, %v228_v7  ;;  %v267_v10 = vpop.f32.mrf.mxu3 }
  0xab   :  { %v268_v12 = vadd.f32 %v267_v10, %v248_v9  ;;  %v287_v13 = vpop.f32.mrf.mxu0  ;;  %v441_v10 = vld [vmem:[#allocation7] sm:$0x1] }
  0xad   :  { %v307_v11 = vpop.f32.mrf.mxu1  ;;  %v288_v14 = vadd.f32 %v287_v13, %v268_v12 }
  0xaf   :  { %v308_v17 = vadd.f32 %v307_v11, %v288_v14 }
  0xb0   :  { %v327_v15 = vpop.f32.mrf.mxu2 }
  0xb1   :  { %v347_v16 = vpop.f32.mrf.mxu3  ;;  %v328_v20 = vadd.f32 %v327_v15, %v308_v17 }
  0xb3   :  { %v367_v19 = vpop.f32.mrf.mxu0  ;;  %v348_v21 = vadd.f32 %v347_v16, %v328_v20  ;;  %v753_v20 = vld [vmem:[#allocation7 + $0x1] ss:$0 sm:$0xff] }
  0xb5   :  { %v387_v18 = vpop.f32.mrf.mxu1  ;;  %v368_v26 = vadd.f32 %v367_v19, %v348_v21 }
  0xb7   :  { %v388_v27 = vadd.f32 %v387_v18, %v368_v26 }
  0xb8   :  { %v407_v22 = vpop.f32.mrf.mxu2 }
  0xb9   :  { %v427_v23 = vpop.f32.mrf.mxu3  ;;  %v408_v32 = vadd.f32 %v407_v22, %v388_v27 }
  0xbb   :  { %v428_v33 = vadd.f32 %v427_v23, %v408_v32 }
  0xbd   :  { %v430_v38 = vmax.f32 %v428_v33, 1e-12 }
  0xbf   :  { %754 = vrsqrt.f32 %v430_v38  ;;  %vm437_vm1 = vweird.f32 %v430_v38 }
  0xc5   :  { %v755_v47 = vpop.eup %754 }
  0xc6   :  { %v432_v49 = vmul.f32 %v755_v47, %v430_v38  ;;  %vm438_vm0 = vweird.f32 %v755_v47 }
  0xc7   :  { %vm439_vm2 = vmor %vm437_vm1, %vm438_vm0 }
  0xc8   :  { %v525_v24 = vpop.f32.mrf.mxu0  ;;  %v538_v25 = vpop.f32.mrf.mxu1  ;;  %v433_v55 = vmul.f32 %v755_v47, %v432_v49 }
  0xc9   :  { %v539_v39 = vadd.f32 %v538_v25, %v525_v24 }
  0xca   :  { %v434_v58 = vmul.f32 0.5, %v433_v55 }
  0xcc   :  { %v435_v0 = vsub.f32 1.5, %v434_v58 }
  0xce   :  { %v436_v4 = vmul.f32 %v755_v47, %v435_v0 }
  0xd0   :  { %v527_v30 = vpop.f32.mrf.mxu0  ;;  %v540_v31 = vpop.f32.mrf.mxu1  ;;  %v440_v9 = vsel %vm439_vm2, %v755_v47, %v436_v4 }
  0xd1   :  { %v551_v28 = vpop.f32.mrf.mxu2  ;;  %v564_v29 = vpop.f32.mrf.mxu3  ;;  %v443_v12 = vmul.f32 %v441_v10, %v440_v9 }
  0xd2   :  { %v552_v40 = vadd.f32 %v551_v28, %v539_v39 }
  0xd3   :  { %v724_v19 = vperm.slane %v443_v12, 0 }
  0xd4   :  { %v565_v43 = vadd.f32 %v564_v29, %v552_v40 }
  0xd8   :  { %v577_v36 = vpop.f32.mrf.mxu0  ;;  %v590_v37 = vpop.f32.mrf.mxu1 }
  0xd9   :  { %v553_v34 = vpop.f32.mrf.mxu2  ;;  %v566_v35 = vpop.f32.mrf.mxu3  ;;  %v578_v46 = vadd.f32 %v577_v36, %v565_v43 }
  0xdb   :  { %v591_v48 = vadd.f32 %v590_v37, %v578_v46 }
  0xe0   :  { %v579_v44 = vpop.f32.mrf.mxu0  ;;  %v592_v45 = vpop.f32.mrf.mxu1 }
  0xe1   :  { %v603_v41 = vpop.f32.mrf.mxu2  ;;  %v616_v42 = vpop.f32.mrf.mxu3 }
  0xe2   :  { %v604_v52 = vadd.f32 %v603_v41, %v591_v48 }
  0xe4   :  { %v617_v56 = vadd.f32 %v616_v42, %v604_v52 }
  0xe8   :  { %v629_v53 = vpop.f32.mrf.mxu0  ;;  %v642_v54 = vpop.f32.mrf.mxu1 }
  0xe9   :  { %v605_v50 = vpop.f32.mrf.mxu2  ;;  %v618_v51 = vpop.f32.mrf.mxu3  ;;  %v630_v57 = vadd.f32 %v629_v53, %v617_v56 }
  0xeb   :  { %v643_v63 = vadd.f32 %v642_v54, %v630_v57 }
  0xf0   :  { %v631_v61 = vpop.f32.mrf.mxu0  ;;  %v644_v62 = vpop.f32.mrf.mxu1 }
  0xf1   :  { %v655_v59 = vpop.f32.mrf.mxu2  ;;  %v668_v60 = vpop.f32.mrf.mxu3 }
  0xf2   :  { %v656_v1 = vadd.f32 %v655_v59, %v643_v63 }
  0xf4   :  { %v669_v5 = vadd.f32 %v668_v60, %v656_v1 }
  0xf8   :  { %v681_v6 = vpop.f32.mrf.mxu0  ;;  %v694_v7 = vpop.f32.mrf.mxu1 }
  0xf9   :  { %v657_v2 = vpop.f32.mrf.mxu2  ;;  %v670_v3 = vpop.f32.mrf.mxu3  ;;  %v682_v8 = vadd.f32 %v681_v6, %v669_v5 }
  0xfb   :  { %v695_v11 = vadd.f32 %v694_v7, %v682_v8 }
 0x100   :  { %v683_v16 = vpop.f32.mrf.mxu0  ;;  %v696_v17 = vpop.f32.mrf.mxu1 }
 0x101   :  { %v707_v13 = vpop.f32.mrf.mxu2  ;;  %v720_v14 = vpop.f32.mrf.mxu3 }
 0x102   :  { %v708_v15 = vadd.f32 %v707_v13, %v695_v11 }
 0x104   :  { %v721_v18 = vadd.f32 %v720_v14, %v708_v15 }
 0x106   :  { %v725_v21 = vmul.f32 %v724_v19, %v721_v18 }
 0x108   :  { %v727_v22 = vadd.f32 %v753_v20, %v725_v21 }
 0x109   :  { %v709_v23 = vpop.f32.mrf.mxu2  ;;  %v722_v24 = vpop.f32.mrf.mxu3 }
 0x10a   :  { %729 = vst.msk [vmem:[#allocation8] sm:$0x3] %vm728_vm3, %v727_v22 }
 0x10b   :  { %740 = dma.vmem_to_hbm [thread:$0]  %s736_s2, 32, %s738_s28, [#allocation4]  }
 0x10c   :  { %856 = dma.done.wait [#allocation4], 32  }
 0x10d   :  { %857 = vsyncadd [#allocation4], 4294967264 }
 0x10e   :  { %745 = vsyncpa [#allocation3], 1 }
 0x10f   :  { %746 = vsyncpa [#allocation6], 1 }
 0x110   :  { %747 = vsyncpa [#allocation4], 1 }

</bundles_post_ra>
